<compile_context>
chip_gen: v7x
topology: tpu7x:2x2x1
jax: 0.10.0
libtpu: 0.0.40
codegen_flags: <defaults>
</compile_context>

<pallas_src>
import functools

import jax
import jax.numpy as jnp
import numpy as np
from jax.experimental import pallas as pl
from jax.experimental.pallas import tpu as pltpu


def _mil_entity_repr_kernel(
    ent_ref,           # (E*C, 1) int32  flattened cluster -> mention index
    mask_ref,          # (E, C)   int32  cluster validity mask
    mr_ref,            # (M, H)   f32    mention reprs for this batch element
    rm_ref,            # (R, Rm)  f32    relation memory
    wv_ref, bv_ref,    # (H, A), (1, A)  attention_V
    wu_ref, bu_ref,    # (H, A), (1, A)  attention_U
    ww_ref, bw_ref,    # (A, 1), (1, 1)  attention_weights
    wrm_ref, brm_ref,  # (Rm, H), (1, H) relation_memory_read_linear
    wo1_ref, wo2_ref, bo_ref,  # (H, H), (Rm, H), (1, H)  output linear (concat folded away)
    out_ref,           # (E, H) f32
    *, E, C, M,
):
    f32 = jnp.float32
    EC = E * C

    # ---- gather mention clusters with a one-hot matmul on the MXU --------
    ent = ent_ref[...]                                                  # (EC, 1) int32
    iota_m = jax.lax.broadcasted_iota(jnp.int32, (EC, M), 1)
    onehot = (iota_m == ent).astype(f32)                                # (EC, M)
    clusters = jnp.dot(onehot, mr_ref[...],
                       preferred_element_type=f32)                      # (EC, H)

    # ---- gated MIL attention scores (all EC rows at once) ----------------
    a_v = jnp.tanh(jnp.dot(clusters, wv_ref[...],
                           preferred_element_type=f32) + bv_ref[...])   # (EC, A)
    pre_u = jnp.dot(clusters, wu_ref[...],
                    preferred_element_type=f32) + bu_ref[...]
    a_u = 1.0 / (1.0 + jnp.exp(-pre_u))                                 # sigmoid  (EC, A)
    att_col = jnp.dot(a_v * a_u, ww_ref[...],
                      preferred_element_type=f32) + bw_ref[...]         # (EC, 1)

    # ---- regroup the (EC,1) score column into an (E,C) tile (matmul trick)
    ec_l = jax.lax.broadcasted_iota(jnp.int32, (E, EC), 1)
    e_start = jax.lax.broadcasted_iota(jnp.int32, (E, EC), 0) * C
    grp = jnp.logical_and(ec_l >= e_start, ec_l < e_start + C).astype(f32)   # (E, EC)

    eye_c = (jax.lax.broadcasted_iota(jnp.int32, (C, C), 0) ==
             jax.lax.broadcasted_iota(jnp.int32, (C, C), 1)).astype(f32)     # (C, C)
    slot = jnp.concatenate([eye_c] * E, axis=0)                              # (EC, C)
    slot_t = jnp.concatenate([eye_c] * E, axis=1)                            # (C, EC)

    att = jnp.dot(grp, att_col * slot, preferred_element_type=f32)           # (E, C)

    # ---- mask + softmax over the cluster axis (lane reduction) -----------
    att = jnp.where(mask_ref[...] == 0, f32(-1e25), att)
    att = att - jnp.max(att, axis=1, keepdims=True)
    p = jnp.exp(att)
    a = p * pl.reciprocal(jnp.sum(p, axis=1, keepdims=True), approx=True)    # (E, C)

    # ---- weighted sum over clusters: one (E,EC) x (EC,H) MXU matmul ------
    w_ec = grp * jnp.dot(a, slot_t, preferred_element_type=f32)              # (E, EC)
    entity_reprs = jnp.dot(w_ec, clusters, preferred_element_type=f32)       # (E, H)

    # ---- relation-memory read / write-back path --------------------------
    rm = rm_ref[...]                                                         # (R, Rm)
    s_proj = jnp.dot(rm, wrm_ref[...],
                     preferred_element_type=f32) + brm_ref[...]              # (R, H)
    s1 = jax.lax.dot_general(entity_reprs, s_proj,
                             dimension_numbers=(((1,), (1,)), ((), ())),
                             preferred_element_type=f32)                     # (E, R)
    s2 = jnp.dot(s1, rm, preferred_element_type=f32)                         # (E, Rm)

    # ---- output linear over cat([entity_reprs, s2]) (concat folded into
    #      two matmuls on the pre-split weight) ----------------------------
    out = (jnp.dot(entity_reprs, wo1_ref[...], preferred_element_type=f32)
           + jnp.dot(s2, wo2_ref[...], preferred_element_type=f32)
           + bo_ref[...])                                                    # (E, H)

    # Single dense, lane-full (E, H) store per grid step.
    out_ref[...] = out.astype(out_ref.dtype)


def mil_attention_entity_representation(mention_reprs, entities, entity_masks,
                                         relation_memory, params):
    B, M, H = mention_reprs.shape
    _, E, C = entities.shape
    R, Rm = relation_memory.shape
    A = params["wv"].shape[1]
    EC = E * C

    ent_col = entities.reshape(B, EC, 1).astype(jnp.int32)
    masks = entity_masks.astype(jnp.int32)

    kernel = functools.partial(_mil_entity_repr_kernel, E=E, C=C, M=M)

    def const_spec(shape):
        return pl.BlockSpec(shape, lambda b: (0,) * len(shape))

    return pl.pallas_call(
        kernel,
        out_shape=jax.ShapeDtypeStruct((B, E, H), jnp.float32),
        grid=(B,),
        in_specs=[
            pl.BlockSpec((None, EC, 1), lambda b: (b, 0, 0)),   # entities (flattened column)
            pl.BlockSpec((None, E, C), lambda b: (b, 0, 0)),    # entity masks
            pl.BlockSpec((None, M, H), lambda b: (b, 0, 0)),    # mention representations
            const_spec((R, Rm)),                                # relation memory
            const_spec((H, A)), const_spec((1, A)),             # attention_V
            const_spec((H, A)), const_spec((1, A)),             # attention_U
            const_spec((A, 1)), const_spec((1, 1)),             # attention_weights
            const_spec((Rm, H)), const_spec((1, H)),            # relation_memory_read_linear
            const_spec((H, H)), const_spec((Rm, H)), const_spec((1, H)),   # output linear
        ],
        out_specs=pl.BlockSpec((None, E, H), lambda b: (b, 0, 0)),
        compiler_params=pltpu.CompilerParams(
            dimension_semantics=("parallel",)),
    )(ent_col, masks, mention_reprs, relation_memory,
      params["wv"], params["bv"], params["wu"], params["bu"],
      params["ww"], params["bw"], params["wrm"], params["brm"],
      params["wo1"], params["wo2"], params["bo"])


def _reference(mention_reprs, entities, entity_masks, relation_memory, p):
    # Pure-JAX mirror of the PyTorch forward.
    gathered = jax.vmap(lambda mr, ent: mr[ent])(mention_reprs, entities)    # [B,E,C,H]
    a_v = jnp.tanh(gathered @ p["wv"] + p["bv"])
    a_u = jax.nn.sigmoid(gathered @ p["wu"] + p["bu"])
    att = (a_v * a_u) @ p["ww"] + p["bw"]                                    # [B,E,C,1]
    att = jnp.where(entity_masks[..., None] == 0, -1e25, att)
    a = jax.nn.softmax(att, axis=2)
    entity_reprs = jnp.sum(a * gathered, axis=2)                             # [B,E,H]
    s_proj = relation_memory @ p["wrm"] + p["brm"]                           # [R,H]
    s1 = jnp.einsum("beh,rh->ber", entity_reprs, s_proj)
    s2 = jnp.einsum("ber,rm->bem", s1, relation_memory)
    return entity_reprs @ p["wo1"] + s2 @ p["wo2"] + p["bo"]


if __name__ == "__main__":
    B, M, H = 2, 64, 128     # batch, #mentions, hidden_size
    E, C = 8, 8              # #entities, max mentions per entity cluster
    A = 64                   # mil_attention_size
    R, Rm = 16, 64           # relation memory slots, relation_memory_size

    key = jax.random.PRNGKey(0)
    ks = jax.random.split(key, 16)

    mention_reprs = jax.random.normal(ks[0], (B, M, H), dtype=jnp.float32)
    entities = jax.random.randint(ks[1], (B, E, C), 0, M, dtype=jnp.int32)
    entity_masks = jax.random.bernoulli(ks[2], 0.7, (B, E, C)).astype(jnp.int32)
    relation_memory = jax.random.normal(ks[3], (R, Rm), dtype=jnp.float32) * 0.1

    def lin(k, fan_in, shape, scale=1.0):
        return (jax.random.normal(k, shape, dtype=jnp.float32) / jnp.sqrt(fan_in)) * scale

    params = dict(
        wv=lin(ks[4], H, (H, A)),
        bv=jax.random.normal(ks[5], (1, A), dtype=jnp.float32) * 0.1,
        wu=lin(ks[6], H, (H, A)),
        bu=jax.random.normal(ks[7], (1, A), dtype=jnp.float32) * 0.1,
        ww=lin(ks[8], A, (A, 1)),
        bw=jax.random.normal(ks[9], (1, 1), dtype=jnp.float32) * 0.1,
        wrm=lin(ks[10], Rm, (Rm, H)),
        brm=jax.random.normal(ks[11], (1, H), dtype=jnp.float32) * 0.1,
        wo1=lin(ks[12], H + Rm, (H, H)),
        wo2=lin(ks[13], H + Rm, (Rm, H)),
        bo=jax.random.normal(ks[14], (1, H), dtype=jnp.float32) * 0.1,
    )

    out = mil_attention_entity_representation(
        mention_reprs, entities, entity_masks, relation_memory, params)
    out = jax.block_until_ready(out)

    ref = _reference(mention_reprs, entities, entity_masks, relation_memory, params)
    ref = jax.block_until_ready(ref)

    np.testing.assert_allclose(np.asarray(out), np.asarray(ref), rtol=3e-2, atol=3e-2)
    print("KERNEL_OK")
</pallas_src>

<mosaic_0001>
module attributes {stable_mosaic.version = 11 : i64} {
  func.func @_mil_entity_repr_kernel(%arg0: i32, %arg1: memref<1x64x1xi32, #tpu.memory_space<vmem>>, %arg2: memref<1x8x8xi32, #tpu.memory_space<vmem>>, %arg3: memref<1x64x128xf32, #tpu.memory_space<vmem>>, %arg4: memref<16x64xf32, #tpu.memory_space<vmem>>, %arg5: memref<128x64xf32, #tpu.memory_space<vmem>>, %arg6: memref<1x64xf32, #tpu.memory_space<vmem>>, %arg7: memref<128x64xf32, #tpu.memory_space<vmem>>, %arg8: memref<1x64xf32, #tpu.memory_space<vmem>>, %arg9: memref<64x1xf32, #tpu.memory_space<vmem>>, %arg10: memref<1x1xf32, #tpu.memory_space<vmem>>, %arg11: memref<64x128xf32, #tpu.memory_space<vmem>>, %arg12: memref<1x128xf32, #tpu.memory_space<vmem>>, %arg13: memref<128x128xf32, #tpu.memory_space<vmem>>, %arg14: memref<64x128xf32, #tpu.memory_space<vmem>>, %arg15: memref<1x128xf32, #tpu.memory_space<vmem>>, %arg16: memref<1x8x128xf32, #tpu.memory_space<vmem>>) attributes {dimension_semantics = [#tpu.dimension_semantics<parallel>], iteration_bounds = array<i64: 2>, scalar_prefetch = 0 : i64, scratch_operands = 0 : i64, tpu.core_type = #tpu.core_type<tc>, window_params = [{transform_indices = @transform_0, window_bounds = array<i64: 1, 64, 1>}, {transform_indices = @transform_1, window_bounds = array<i64: 1, 8, 8>}, {transform_indices = @transform_2, window_bounds = array<i64: 1, 64, 128>}, {pipeline_mode = #tpu.pipeline_mode<synchronous>, transform_indices = @transform_3, window_bounds = array<i64: 16, 64>}, {pipeline_mode = #tpu.pipeline_mode<synchronous>, transform_indices = @transform_4, window_bounds = array<i64: 128, 64>}, {pipeline_mode = #tpu.pipeline_mode<synchronous>, transform_indices = @transform_5, window_bounds = array<i64: 1, 64>}, {pipeline_mode = #tpu.pipeline_mode<synchronous>, transform_indices = @transform_6, window_bounds = array<i64: 128, 64>}, {pipeline_mode = #tpu.pipeline_mode<synchronous>, transform_indices = @transform_7, window_bounds = array<i64: 1, 64>}, {pipeline_mode = #tpu.pipeline_mode<synchronous>, transform_indices = @transform_8, window_bounds = array<i64: 64, 1>}, {pipeline_mode = #tpu.pipeline_mode<synchronous>, transform_indices = @transform_9, window_bounds = array<i64: 1, 1>}, {pipeline_mode = #tpu.pipeline_mode<synchronous>, transform_indices = @transform_10, window_bounds = array<i64: 64, 128>}, {pipeline_mode = #tpu.pipeline_mode<synchronous>, transform_indices = @transform_11, window_bounds = array<i64: 1, 128>}, {pipeline_mode = #tpu.pipeline_mode<synchronous>, transform_indices = @transform_12, window_bounds = array<i64: 128, 128>}, {pipeline_mode = #tpu.pipeline_mode<synchronous>, transform_indices = @transform_13, window_bounds = array<i64: 64, 128>}, {pipeline_mode = #tpu.pipeline_mode<synchronous>, transform_indices = @transform_14, window_bounds = array<i64: 1, 128>}, {transform_indices = @transform_15, window_bounds = array<i64: 1, 8, 128>}]} {
    %c0 = arith.constant 0 : index
    %c0_0 = arith.constant 0 : index
    %c0_1 = arith.constant 0 : index
    %0 = vector.load %arg1[%c0, %c0_0, %c0_1] : memref<1x64x1xi32, #tpu.memory_space<vmem>>, vector<1x64x1xi32>
    %1 = vector.shape_cast %0 : vector<1x64x1xi32> to vector<64x1xi32>
    %2 = tpu.iota {dimensions = array<i32: 1>} : vector<64x64xi32>
    %3 = vector.broadcast %1 : vector<64x1xi32> to vector<64x64xi32>
    %4 = arith.cmpi eq, %2, %3 : vector<64x64xi32>
    %5 = arith.extui %4 : vector<64x64xi1> to vector<64x64xi32>
    %6 = arith.sitofp %5 : vector<64x64xi32> to vector<64x64xf32>
    %c0_2 = arith.constant 0 : index
    %c0_3 = arith.constant 0 : index
    %c0_4 = arith.constant 0 : index
    %7 = vector.load %arg3[%c0_2, %c0_3, %c0_4] : memref<1x64x128xf32, #tpu.memory_space<vmem>>, vector<1x64x128xf32>
    %8 = vector.shape_cast %7 : vector<1x64x128xf32> to vector<64x128xf32>
    %cst = arith.constant dense<0.000000e+00> : vector<64x128xf32>
    %9 = tpu.matmul %6, %8, %cst {dimension_numbers = #tpu.dot_dimension_numbers<[1], [0], [0], [1], [0, 0, 1, 1], [], []>} : vector<64x64xf32>, vector<64x128xf32>, vector<64x128xf32> -> vector<64x128xf32>
    %c0_5 = arith.constant 0 : index
    %c0_6 = arith.constant 0 : index
    %10 = vector.load %arg5[%c0_5, %c0_6] : memref<128x64xf32, #tpu.memory_space<vmem>>, vector<128x64xf32>
    %cst_7 = arith.constant dense<0.000000e+00> : vector<64x64xf32>
    %11 = tpu.matmul %9, %10, %cst_7 {dimension_numbers = #tpu.dot_dimension_numbers<[1], [0], [0], [1], [0, 0, 1, 1], [], []>} : vector<64x128xf32>, vector<128x64xf32>, vector<64x64xf32> -> vector<64x64xf32>
    %c0_8 = arith.constant 0 : index
    %c0_9 = arith.constant 0 : index
    %12 = vector.load %arg6[%c0_8, %c0_9] : memref<1x64xf32, #tpu.memory_space<vmem>>, vector<1x64xf32>
    %13 = vector.broadcast %12 : vector<1x64xf32> to vector<64x64xf32>
    %14 = arith.addf %11, %13 : vector<64x64xf32>
    %15 = math.tanh %14 : vector<64x64xf32>
    %c0_10 = arith.constant 0 : index
    %c0_11 = arith.constant 0 : index
    %16 = vector.load %arg7[%c0_10, %c0_11] : memref<128x64xf32, #tpu.memory_space<vmem>>, vector<128x64xf32>
    %cst_12 = arith.constant dense<0.000000e+00> : vector<64x64xf32>
    %17 = tpu.matmul %9, %16, %cst_12 {dimension_numbers = #tpu.dot_dimension_numbers<[1], [0], [0], [1], [0, 0, 1, 1], [], []>} : vector<64x128xf32>, vector<128x64xf32>, vector<64x64xf32> -> vector<64x64xf32>
    %c0_13 = arith.constant 0 : index
    %c0_14 = arith.constant 0 : index
    %18 = vector.load %arg8[%c0_13, %c0_14] : memref<1x64xf32, #tpu.memory_space<vmem>>, vector<1x64xf32>
    %19 = vector.broadcast %18 : vector<1x64xf32> to vector<64x64xf32>
    %20 = arith.addf %17, %19 : vector<64x64xf32>
    %cst_15 = arith.constant 0.000000e+00 : f32
    %21 = vector.broadcast %cst_15 : f32 to vector<64x64xf32>
    %22 = arith.subf %21, %20 : vector<64x64xf32>
    %23 = math.exp %22 : vector<64x64xf32>
    %cst_16 = arith.constant 1.000000e+00 : f32
    %24 = vector.broadcast %cst_16 : f32 to vector<64x64xf32>
    %25 = arith.addf %24, %23 : vector<64x64xf32>
    %cst_17 = arith.constant 1.000000e+00 : f32
    %26 = vector.broadcast %cst_17 : f32 to vector<64x64xf32>
    %27 = arith.divf %26, %25 : vector<64x64xf32>
    %28 = arith.mulf %15, %27 : vector<64x64xf32>
    %c0_18 = arith.constant 0 : index
    %c0_19 = arith.constant 0 : index
    %29 = vector.load %arg9[%c0_18, %c0_19] : memref<64x1xf32, #tpu.memory_space<vmem>>, vector<64x1xf32>
    %cst_20 = arith.constant dense<0.000000e+00> : vector<64x1xf32>
    %30 = tpu.matmul %28, %29, %cst_20 {dimension_numbers = #tpu.dot_dimension_numbers<[1], [0], [0], [1], [0, 0, 1, 1], [], []>} : vector<64x64xf32>, vector<64x1xf32>, vector<64x1xf32> -> vector<64x1xf32>
    %c0_21 = arith.constant 0 : index
    %c0_22 = arith.constant 0 : index
    %31 = vector.load %arg10[%c0_21, %c0_22] : memref<1x1xf32, #tpu.memory_space<vmem>>, vector<1x1xf32>
    %32 = vector.broadcast %31 : vector<1x1xf32> to vector<64x1xf32>
    %33 = arith.addf %30, %32 : vector<64x1xf32>
    %34 = tpu.iota {dimensions = array<i32: 1>} : vector<8x64xi32>
    %35 = tpu.iota {dimensions = array<i32: 0>} : vector<8x64xi32>
    %c8_i32 = arith.constant 8 : i32
    %36 = vector.broadcast %c8_i32 : i32 to vector<8x64xi32>
    %37 = arith.muli %35, %36 : vector<8x64xi32>
    %38 = arith.cmpi sge, %34, %37 : vector<8x64xi32>
    %c8_i32_23 = arith.constant 8 : i32
    %39 = vector.broadcast %c8_i32_23 : i32 to vector<8x64xi32>
    %40 = arith.addi %37, %39 : vector<8x64xi32>
    %41 = arith.cmpi slt, %34, %40 : vector<8x64xi32>
    %42 = arith.andi %38, %41 : vector<8x64xi1>
    %43 = arith.extui %42 : vector<8x64xi1> to vector<8x64xi32>
    %44 = arith.sitofp %43 : vector<8x64xi32> to vector<8x64xf32>
    %45 = tpu.iota {dimensions = array<i32: 0>} : vector<8x8xi32>
    %46 = tpu.iota {dimensions = array<i32: 1>} : vector<8x8xi32>
    %47 = arith.cmpi eq, %45, %46 : vector<8x8xi32>
    %48 = arith.extui %47 : vector<8x8xi1> to vector<8x8xi32>
    %49 = arith.sitofp %48 : vector<8x8xi32> to vector<8x8xf32>
    %50 = tpu.concatenate %49, %49, %49, %49, %49, %49, %49, %49 in 0 : vector<8x8xf32>, vector<8x8xf32>, vector<8x8xf32>, vector<8x8xf32>, vector<8x8xf32>, vector<8x8xf32>, vector<8x8xf32>, vector<8x8xf32> -> vector<64x8xf32>
    %51 = tpu.concatenate %49, %49, %49, %49, %49, %49, %49, %49 in 1 : vector<8x8xf32>, vector<8x8xf32>, vector<8x8xf32>, vector<8x8xf32>, vector<8x8xf32>, vector<8x8xf32>, vector<8x8xf32>, vector<8x8xf32> -> vector<8x64xf32>
    %52 = vector.broadcast %33 : vector<64x1xf32> to vector<64x8xf32>
    %53 = arith.mulf %52, %50 : vector<64x8xf32>
    %cst_24 = arith.constant dense<0.000000e+00> : vector<8x8xf32>
    %54 = tpu.matmul %44, %53, %cst_24 {dimension_numbers = #tpu.dot_dimension_numbers<[1], [0], [0], [1], [0, 0, 1, 1], [], []>} : vector<8x64xf32>, vector<64x8xf32>, vector<8x8xf32> -> vector<8x8xf32>
    %c0_25 = arith.constant 0 : index
    %c0_26 = arith.constant 0 : index
    %c0_27 = arith.constant 0 : index
    %55 = vector.load %arg2[%c0_25, %c0_26, %c0_27] : memref<1x8x8xi32, #tpu.memory_space<vmem>>, vector<1x8x8xi32>
    %56 = vector.shape_cast %55 : vector<1x8x8xi32> to vector<8x8xi32>
    %c0_i32 = arith.constant 0 : i32
    %57 = vector.broadcast %c0_i32 : i32 to vector<8x8xi32>
    %58 = arith.cmpi eq, %56, %57 : vector<8x8xi32>
    %cst_28 = arith.constant -9.99999956E+24 : f32
    %59 = vector.broadcast %cst_28 : f32 to vector<8x8xf32>
    %60 = arith.select %58, %59, %54 : vector<8x8xi1>, vector<8x8xf32>
    %cst_29 = arith.constant dense<0xFF800000> : vector<8xf32>
    %61 = vector.multi_reduction <maximumf>, %60, %cst_29 [1] : vector<8x8xf32> to vector<8xf32>
    %62 = vector.shape_cast %61 : vector<8xf32> to vector<8x1xf32>
    %63 = vector.broadcast %62 : vector<8x1xf32> to vector<8x8xf32>
    %64 = arith.subf %60, %63 : vector<8x8xf32>
    %65 = math.exp %64 : vector<8x8xf32>
    %cst_30 = arith.constant dense<0.000000e+00> : vector<8xf32>
    %66 = vector.multi_reduction <add>, %65, %cst_30 [1] : vector<8x8xf32> to vector<8xf32>
    %67 = vector.shape_cast %66 : vector<8xf32> to vector<8x1xf32>
    %68 = tpu.reciprocal %67 {approx = true} : vector<8x1xf32> -> vector<8x1xf32>
    %69 = vector.broadcast %68 : vector<8x1xf32> to vector<8x8xf32>
    %70 = arith.mulf %65, %69 : vector<8x8xf32>
    %cst_31 = arith.constant dense<0.000000e+00> : vector<8x64xf32>
    %71 = tpu.matmul %70, %51, %cst_31 {dimension_numbers = #tpu.dot_dimension_numbers<[1], [0], [0], [1], [0, 0, 1, 1], [], []>} : vector<8x8xf32>, vector<8x64xf32>, vector<8x64xf32> -> vector<8x64xf32>
    %72 = arith.mulf %44, %71 : vector<8x64xf32>
    %cst_32 = arith.constant dense<0.000000e+00> : vector<8x128xf32>
    %73 = tpu.matmul %72, %9, %cst_32 {dimension_numbers = #tpu.dot_dimension_numbers<[1], [0], [0], [1], [0, 0, 1, 1], [], []>} : vector<8x64xf32>, vector<64x128xf32>, vector<8x128xf32> -> vector<8x128xf32>
    %c0_33 = arith.constant 0 : index
    %c0_34 = arith.constant 0 : index
    %74 = vector.load %arg4[%c0_33, %c0_34] : memref<16x64xf32, #tpu.memory_space<vmem>>, vector<16x64xf32>
    %c0_35 = arith.constant 0 : index
    %c0_36 = arith.constant 0 : index
    %75 = vector.load %arg11[%c0_35, %c0_36] : memref<64x128xf32, #tpu.memory_space<vmem>>, vector<64x128xf32>
    %cst_37 = arith.constant dense<0.000000e+00> : vector<16x128xf32>
    %76 = tpu.matmul %74, %75, %cst_37 {dimension_numbers = #tpu.dot_dimension_numbers<[1], [0], [0], [1], [0, 0, 1, 1], [], []>} : vector<16x64xf32>, vector<64x128xf32>, vector<16x128xf32> -> vector<16x128xf32>
    %c0_38 = arith.constant 0 : index
    %c0_39 = arith.constant 0 : index
    %77 = vector.load %arg12[%c0_38, %c0_39] : memref<1x128xf32, #tpu.memory_space<vmem>>, vector<1x128xf32>
    %78 = vector.broadcast %77 : vector<1x128xf32> to vector<16x128xf32>
    %79 = arith.addf %76, %78 : vector<16x128xf32>
    %cst_40 = arith.constant dense<0.000000e+00> : vector<8x16xf32>
    %80 = tpu.matmul %73, %79, %cst_40 {dimension_numbers = #tpu.dot_dimension_numbers<[1], [1], [0], [0], [0, 0, 1, 0], [], []>} : vector<8x128xf32>, vector<16x128xf32>, vector<8x16xf32> -> vector<8x16xf32>
    %cst_41 = arith.constant dense<0.000000e+00> : vector<8x64xf32>
    %81 = tpu.matmul %80, %74, %cst_41 {dimension_numbers = #tpu.dot_dimension_numbers<[1], [0], [0], [1], [0, 0, 1, 1], [], []>} : vector<8x16xf32>, vector<16x64xf32>, vector<8x64xf32> -> vector<8x64xf32>
    %c0_42 = arith.constant 0 : index
    %c0_43 = arith.constant 0 : index
    %82 = vector.load %arg13[%c0_42, %c0_43] : memref<128x128xf32, #tpu.memory_space<vmem>>, vector<128x128xf32>
    %cst_44 = arith.constant dense<0.000000e+00> : vector<8x128xf32>
    %83 = tpu.matmul %73, %82, %cst_44 {dimension_numbers = #tpu.dot_dimension_numbers<[1], [0], [0], [1], [0, 0, 1, 1], [], []>} : vector<8x128xf32>, vector<128x128xf32>, vector<8x128xf32> -> vector<8x128xf32>
    %c0_45 = arith.constant 0 : index
    %c0_46 = arith.constant 0 : index
    %84 = vector.load %arg14[%c0_45, %c0_46] : memref<64x128xf32, #tpu.memory_space<vmem>>, vector<64x128xf32>
    %cst_47 = arith.constant dense<0.000000e+00> : vector<8x128xf32>
    %85 = tpu.matmul %81, %84, %cst_47 {dimension_numbers = #tpu.dot_dimension_numbers<[1], [0], [0], [1], [0, 0, 1, 1], [], []>} : vector<8x64xf32>, vector<64x128xf32>, vector<8x128xf32> -> vector<8x128xf32>
    %86 = arith.addf %83, %85 : vector<8x128xf32>
    %c0_48 = arith.constant 0 : index
    %c0_49 = arith.constant 0 : index
    %87 = vector.load %arg15[%c0_48, %c0_49] : memref<1x128xf32, #tpu.memory_space<vmem>>, vector<1x128xf32>
    %88 = vector.broadcast %87 : vector<1x128xf32> to vector<8x128xf32>
    %89 = arith.addf %86, %88 : vector<8x128xf32>
    %c0_50 = arith.constant 0 : index
    %c0_51 = arith.constant 0 : index
    %c0_52 = arith.constant 0 : index
    %90 = vector.load %arg16[%c0_50, %c0_51, %c0_52] : memref<1x8x128xf32, #tpu.memory_space<vmem>>, vector<1x8x128xf32>
    %91 = vector.shape_cast %90 : vector<1x8x128xf32> to vector<8x128xf32>
    %92 = vector.shape_cast %89 : vector<8x128xf32> to vector<1x8x128xf32>
    tpu.vector_store %arg16[%c0_50, %c0_51, %c0_52], %92 {strides = array<i32>} : memref<1x8x128xf32, #tpu.memory_space<vmem>>, vector<1x8x128xf32>,
    return
  }
  func.func @transform_0(%arg0: i32) -> (i32, i32, i32) {
    %c0_i32 = arith.constant 0 : i32
    %c0_i32_0 = arith.constant 0 : i32
    %c0_i32_1 = arith.constant 0 : i32
    return %arg0, %c0_i32, %c0_i32_0 : i32, i32, i32
  }
  func.func @transform_1(%arg0: i32) -> (i32, i32, i32) {
    %c0_i32 = arith.constant 0 : i32
    %c0_i32_0 = arith.constant 0 : i32
    %c0_i32_1 = arith.constant 0 : i32
    return %arg0, %c0_i32, %c0_i32_0 : i32, i32, i32
  }
  func.func @transform_2(%arg0: i32) -> (i32, i32, i32) {
    %c0_i32 = arith.constant 0 : i32
    %c0_i32_0 = arith.constant 0 : i32
    %c0_i32_1 = arith.constant 0 : i32
    return %arg0, %c0_i32, %c0_i32_0 : i32, i32, i32
  }
  func.func @transform_3(%arg0: i32) -> (i32, i32) {
    %c0_i32 = arith.constant 0 : i32
    %c0_i32_0 = arith.constant 0 : i32
    %c0_i32_1 = arith.constant 0 : i32
    return %c0_i32, %c0_i32_0 : i32, i32
  }
  func.func @transform_4(%arg0: i32) -> (i32, i32) {
    %c0_i32 = arith.constant 0 : i32
    %c0_i32_0 = arith.constant 0 : i32
    %c0_i32_1 = arith.constant 0 : i32
    return %c0_i32, %c0_i32_0 : i32, i32
  }
  func.func @transform_5(%arg0: i32) -> (i32, i32) {
    %c0_i32 = arith.constant 0 : i32
    %c0_i32_0 = arith.constant 0 : i32
    %c0_i32_1 = arith.constant 0 : i32
    return %c0_i32, %c0_i32_0 : i32, i32
  }
  func.func @transform_6(%arg0: i32) -> (i32, i32) {
    %c0_i32 = arith.constant 0 : i32
    %c0_i32_0 = arith.constant 0 : i32
    %c0_i32_1 = arith.constant 0 : i32
    return %c0_i32, %c0_i32_0 : i32, i32
  }
  func.func @transform_7(%arg0: i32) -> (i32, i32) {
    %c0_i32 = arith.constant 0 : i32
    %c0_i32_0 = arith.constant 0 : i32
    %c0_i32_1 = arith.constant 0 : i32
    return %c0_i32, %c0_i32_0 : i32, i32
  }
  func.func @transform_8(%arg0: i32) -> (i32, i32) {
    %c0_i32 = arith.constant 0 : i32
    %c0_i32_0 = arith.constant 0 : i32
    %c0_i32_1 = arith.constant 0 : i32
    return %c0_i32, %c0_i32_0 : i32, i32
  }
  func.func @transform_9(%arg0: i32) -> (i32, i32) {
    %c0_i32 = arith.constant 0 : i32
    %c0_i32_0 = arith.constant 0 : i32
    %c0_i32_1 = arith.constant 0 : i32
    return %c0_i32, %c0_i32_0 : i32, i32
  }
  func.func @transform_10(%arg0: i32) -> (i32, i32) {
    %c0_i32 = arith.constant 0 : i32
    %c0_i32_0 = arith.constant 0 : i32
    %c0_i32_1 = arith.constant 0 : i32
    return %c0_i32, %c0_i32_0 : i32, i32
  }
  func.func @transform_11(%arg0: i32) -> (i32, i32) {
    %c0_i32 = arith.constant 0 : i32
    %c0_i32_0 = arith.constant 0 : i32
    %c0_i32_1 = arith.constant 0 : i32
    return %c0_i32, %c0_i32_0 : i32, i32
  }
  func.func @transform_12(%arg0: i32) -> (i32, i32) {
    %c0_i32 = arith.constant 0 : i32
    %c0_i32_0 = arith.constant 0 : i32
    %c0_i32_1 = arith.constant 0 : i32
    return %c0_i32, %c0_i32_0 : i32, i32
  }
  func.func @transform_13(%arg0: i32) -> (i32, i32) {
    %c0_i32 = arith.constant 0 : i32
    %c0_i32_0 = arith.constant 0 : i32
    %c0_i32_1 = arith.constant 0 : i32
    return %c0_i32, %c0_i32_0 : i32, i32
  }
  func.func @transform_14(%arg0: i32) -> (i32, i32) {
    %c0_i32 = arith.constant 0 : i32
    %c0_i32_0 = arith.constant 0 : i32
    %c0_i32_1 = arith.constant 0 : i32
    return %c0_i32, %c0_i32_0 : i32, i32
  }
  func.func @transform_15(%arg0: i32) -> (i32, i32, i32) {
    %c0_i32 = arith.constant 0 : i32
    %c0_i32_0 = arith.constant 0 : i32
    %c0_i32_1 = arith.constant 0 : i32
    return %arg0, %c0_i32, %c0_i32_0 : i32, i32, i32
  }
}

</mosaic_0001>

<bundles_post_ra>
// kernel: tpu_custom_call.1
= control target key start
LH: loop header
LB: loop body
LE: loop exit
PB: predicated region body
PF: predicated region fallthrough
CT: control target
= control target key end

     0   :  { %s3412_s0 = inlined_call_operand.vmem [shape: s32[2,64,1], index: 0, kind: input, shape index: {}]   ;;  %s3413_s1 = inlined_call_operand.vmem [shape: s32[2,8,8], index: 1, kind: input, shape index: {}]   ;;  %s3414_s2 = inlined_call_operand.vmem [shape: f32[2,64,128], index: 2, kind: input, shape index: {}]   ;;  %s3415_s3 = inlined_call_operand.vmem [shape: f32[16,64], index: 3, kind: input, shape index: {}]   ;;  %s3416_s4 = inlined_call_operand.vmem [shape: f32[128,64], index: 4, kind: input, shape index: {}]   ;;  %s3417_s5 = inlined_call_operand.vmem [shape: f32[1,64], index: 5, kind: input, shape index: {}]   ;;  %s3418_s6 = inlined_call_operand.vmem [shape: f32[128,64], index: 6, kind: input, shape index: {}]   ;;  %s3419_s7 = inlined_call_operand.vmem [shape: f32[1,64], index: 7, kind: input, shape index: {}]   ;;  %s3420_s8 = inlined_call_operand.vmem [shape: f32[64,1], index: 8, kind: input, shape index: {}]   ;;  %s3421_s9 = inlined_call_operand.<no memory space> [shape: f32[1,1], index: 9, kind: input, shape index: {}]   ;;  %s3422_s10 = inlined_call_operand.vmem [shape: f32[64,128], index: 10, kind: input, shape index: {}]   ;;  %s3423_s11 = inlined_call_operand.vmem [shape: f32[1,128], index: 11, kind: input, shape index: {}]   ;;  %s3424_s12 = inlined_call_operand.vmem [shape: f32[128,128], index: 12, kind: input, shape index: {}]   ;;  %s3425_s13 = inlined_call_operand.vmem [shape: f32[64,128], index: 13, kind: input, shape index: {}]   ;;  %s3426_s14 = inlined_call_operand.vmem [shape: f32[1,128], index: 14, kind: input, shape index: {}]   ;;  %s3427_s15 = inlined_call_operand.hbm [shape: f32[2,8,128], index: 15, kind: output, shape index: {}]  }
   0x1   :  { %3431 = sst [smem:[#allocation9_spill]] %s3412_s0  ;;  %v20_v0 = vstv %s3421_s9 }
   0x2   :  { %3432 = sst [smem:[#allocation10_spill]] %s3414_s2  ;;  %21 = vst [vmem:[#allocation2] sm:$0x1] %v20_v0 }
   0x3   :  { %22 = vsyncpa [#allocation4], 0 }
   0x4   :  { %24 = vsyncpa [#allocation4 + $0x1], 0  ;;  %s2947_s20 = smov 0   ;;  %s2949_s21 = smov 0  }
   0x5   :  { %s2951_s22 = smov 0   ;;  %s2953_s23 = smov 0  }
   0x6 LB: > { %3433 = sst [smem:[#allocation6_spill]] %s2846_s22  ;;  %s2968_s9 = sadd.s32 4294967295, %s2850_s23   ;;  %s2850_s23 = sphi %s2953_s23, %s3440_s23   ;;  %s2846_s22 = sphi %s2951_s22, %s3442_s22   ;;  %s2842_s21 = sphi %s2949_s21, %s3444_s21   ;;  %s2838_s20 = sphi %s2947_s20, %s3443_s20  }
   0x7   : > { %s2036_s24 = sadd.s32 4294967294, %s2850_s23   ;;  %s2972_s25 = sadd.s32 1, %s2850_s23  }
   0x8   : > { %3434 = sst [smem:[#allocation7_spill]] %s2972_s25  ;;  %s367_s26 = sadd.s32 1, %s2846_s22 }
   0x9   : > { %s364_s27 = ssub.s32 %s2850_s23, %s2972_s25  ;;  %p377_p0 = scmp.ne.s32.totalorder %s2846_s22, %s2842_s21 }
   0xa   : > { %p365_p1 = scmp.eq.s32.totalorder %s364_s27, 0  ;;  %p378_p2 = scmp.eq.s32.totalorder %s2968_s9, 1 }
   0xb   : > { %p383_p3 = scmp.ne.s32.totalorder %s2842_s21, %s2838_s20  ;;  %p384_p4 = scmp.eq.s32.totalorder %s2036_s24, 1 }
   0xc   : > { %s2983_s28 = scalar_select %p365_p1, %s2846_s22, %s367_s26  }
   0xd   : > { %p2985_p5 = por %p378_p2, %p377_p0  ;;  %p2989_p6 = por %p384_p4, %p383_p3 }
   0xe   : > { %3435 = sst [smem:[#allocation8_spill]] %s2983_s28  ;;  %p2039_p7 = scmp.ge.s32.totalorder %s2850_s23, 1 }
   0xf   : > { %p461_p8 = scmp.lt.s32.totalorder %s2850_s23, 3 }
  0x11   : > { %p462_p9 = pnand %p2039_p7, %p461_p8 }
  0x12   : > { %p518_p10 = scmp.lt.s32.totalorder (!%p462_p9), %s2968_s9, 1  ;;  %v2852_v1 = vmov (!%p462_p9), 0   ;;  %s3438_s0 = sld [smem:[#allocation9_spill]] (!%p462_p9)  ;;  %v728_v22 = vld [vmem:[%s3416_s4] sm:$0xff] (!%p462_p9)  ;;  %v729_v23 = vld [vmem:[%s3416_s4 + $0x8] sm:$0xff] (!%p462_p9)  ;;  %v730_v27 = vld [vmem:[%s3416_s4 + $0x10] sm:$0xff] (!%p462_p9)  ;;  %v540_v49 = vlaneseq (!%p462_p9) }
  0x13   : > { %465 = sbr.rel (%p462_p9) target bundleno = 2596 (0xa24), region = 80  ;;  %2735 = vset.pattern.permute.xlu1 (!%p462_p9), %v2852_v1  ;;  %2734 = vset.pattern.permute.xlu0 (!%p462_p9), %v2852_v1  ;;  %s3439_s2 = sld [smem:[#allocation10_spill]] (!%p462_p9)  ;;  %v864_v24 = vld [vmem:[%s3418_s6] sm:$0xff] (!%p462_p9)  ;;  %v2522_v25 = vpack.c.bf16 (!%p462_p9), %v729_v23, %v728_v22  ;;  %v865_v26 = vld [vmem:[%s3418_s6 + $0x8] sm:$0xff] (!%p462_p9)  ;;  %v731_v28 = vld [vmem:[%s3416_s4 + $0x18] sm:$0xff] (!%p462_p9)  ;;  %vm598_vm0 = vcmask (!%p462_p9), 523264  }
  0x14   : > { %v2554_v29 = vpack.c.bf16 (!%p462_p9), %v865_v26, %v864_v24  ;;  %v2526_v30 = vpack.c.bf16 (!%p462_p9), %v731_v28, %v730_v27  ;;  %v732_v31 = vld [vmem:[%s3416_s4 + $0x20] sm:$0xff] (!%p462_p9)  ;;  %v733_v32 = vld [vmem:[%s3416_s4 + $0x28] sm:$0xff] (!%p462_p9)  ;;  %v734_v34 = vld [vmem:[%s3416_s4 + $0x30] sm:$0xff] (!%p462_p9)  ;;  %v3061_v50 = vand.u32 (!%p462_p9), 127, %v540_v49  ;;  %v2853_v53 = vmov (!%p462_p9), 0.0   ;;  %s2856_s22 = smov (!%p462_p9), 16  }
  0x15   : > { %2523 = vmatprep.subr.bf16.mxu1 (!%p462_p9), %v2522_v25  ;;  %v2530_v33 = vpack.c.bf16 (!%p462_p9), %v733_v32, %v732_v31  ;;  %v735_v35 = vld [vmem:[%s3416_s4 + $0x38] sm:$0xff] (!%p462_p9)  ;;  %v736_v37 = vld [vmem:[%s3416_s4 + $0x40] sm:$0xff] (!%p462_p9)  ;;  %v737_v38 = vld [vmem:[%s3416_s4 + $0x48] sm:$0xff] (!%p462_p9)  ;;  %vm2855_vm9 = vmmov (!%p462_p9), 0   ;;  %s2857_s25 = smov (!%p462_p9), 32   ;;  %vm1226_vm15 = vcmask (!%p462_p9), 64512  }
  0x16   : > { %2525 = vmatpush3.bf16.msra.mxu1 (!%p462_p9), %v2522_v25  ;;  %v2534_v36 = vpack.c.bf16 (!%p462_p9), %v735_v35, %v734_v34  ;;  %v2538_v39 = vpack.c.bf16 (!%p462_p9), %v737_v38, %v736_v37  ;;  %v738_v40 = vld [vmem:[%s3416_s4 + $0x50] sm:$0xff] (!%p462_p9)  ;;  %v739_v41 = vld [vmem:[%s3416_s4 + $0x58] sm:$0xff] (!%p462_p9)  ;;  %v740_v43 = vld [vmem:[%s3416_s4 + $0x60] sm:$0xff] (!%p462_p9)  ;;  %v2854_v25 = vmov (!%p462_p9), 0.0|0.0   ;;  %s2858_s19 = smov (!%p462_p9), 8   ;;  %s2859_s26 = smov (!%p462_p9), 24  }
  0x17   : > { %2527 = vmatprep.subr.bf16.mxu1 (!%p462_p9), %v2526_v30  ;;  %v2542_v42 = vpack.c.bf16 (!%p462_p9), %v739_v41, %v738_v40  ;;  %v741_v44 = vld [vmem:[%s3416_s4 + $0x68] sm:$0xff] (!%p462_p9)  ;;  %v742_v46 = vld [vmem:[%s3416_s4 + $0x70] sm:$0xff] (!%p462_p9)  ;;  %v743_v47 = vld [vmem:[%s3416_s4 + $0x78] sm:$0xff] (!%p462_p9)  ;;  %s2861_s27 = smov (!%p462_p9), 56  }
  0x18   : > { %v2546_v45 = vpack.c.bf16 (!%p462_p9), %v741_v44, %v740_v43  ;;  %v2550_v48 = vpack.c.bf16 (!%p462_p9), %v743_v47, %v742_v46  ;;  %v866_v55 = vld [vmem:[%s3418_s6 + $0x10] sm:$0xff] (!%p462_p9)  ;;  %v867_v56 = vld [vmem:[%s3418_s6 + $0x18] sm:$0xff] (!%p462_p9)  ;;  %v868_v62 = vld [vmem:[%s3418_s6 + $0x20] sm:$0xff] (!%p462_p9) }
  0x19   : > { %v2558_v60 = vpack.c.bf16 (!%p462_p9), %v867_v56, %v866_v55  ;;  %v869_v63 = vld [vmem:[%s3418_s6 + $0x28] sm:$0xff] (!%p462_p9)  ;;  %v878_v22 = vld [vmem:[%s3418_s6 + $0x70] sm:$0xff] (!%p462_p9)  ;;  %v879_v23 = vld [vmem:[%s3418_s6 + $0x78] sm:$0xff] (!%p462_p9) }
  0x1a   : > { %s2997_s16 = scalar_select %p518_p10, %s2968_s9, 1  ;;  %2529 = vmatpush3.bf16.msra.mxu1 %v2526_v30  ;;  %v2582_v24 = vpack.c.bf16 %v879_v23, %v878_v22  ;;  %v1048_v38 = vld [vmem:[%s3420_s8] sm:$0xff]  ;;  %v1050_v41 = vld [vmem:[%s3420_s8 + $0x10] sm:$0xff] }
  0x1b   : > { %2531 = vmatprep.subr.bf16.mxu1 %v2530_v33  ;;  %v1052_v44 = vld [vmem:[%s3420_s8 + $0x20] sm:$0xff]  ;;  %v1054_v47 = vld [vmem:[%s3420_s8 + $0x30] sm:$0xff] }
  0x1c   : > { %s2088_s17 = sshll.u32 %s2997_s16, 6 }
  0x1d   : > { %s522_s24 = scalar_lea.vmem %s3438_s0, %s2088_s17  ;;  %s531_s28 = scalar_lea.vmem %s3439_s2, %s2088_s17 }
  0x1e   : > { %v534_v2 = vld [vmem:[%s522_s24 + $0x10] sm:$0xff]  ;;  %v532_v3 = vld [vmem:[%s522_s24] sm:$0xff]  ;;  %v535_v4 = vld [vmem:[%s522_s24 + $0x18] sm:$0xff]  ;;  %2533 = vmatpush3.bf16.msra.mxu1 %v2530_v33  ;;  %s2862_s0 = smov 48  }
  0x1f   : > { %549 = vperm.xlu1 %2735, %v534_v2   ;;  %543 = vperm.xlu0 %2734, %v532_v3   ;;  %v533_v5 = vld [vmem:[%s522_s24 + $0x8] sm:$0xff]  ;;  %v590_v6 = vld [vmem:[%s531_s28] sm:$0xff]  ;;  %v592_v8 = vld [vmem:[%s531_s28 + $0x10] sm:$0xff]  ;;  %v2562_v2 = vpack.c.bf16 %v869_v63, %v868_v62 }
  0x20   : > { %v591_v7 = vld [vmem:[%s531_s28 + $0x8] sm:$0xff]  ;;  %v593_v9 = vld [vmem:[%s531_s28 + $0x18] sm:$0xff]  ;;  %v594_v12 = vld [vmem:[%s531_s28 + $0x20] sm:$0xff]  ;;  %2535 = vmatprep.subr.bf16.mxu1 %v2534_v36 }
  0x21   : > { %v2506_v10 = vpack.c.bf16 %v591_v7, %v590_v6  ;;  %v2510_v11 = vpack.c.bf16 %v593_v9, %v592_v8  ;;  %v595_v13 = vld [vmem:[%s531_s28 + $0x28] sm:$0xff]  ;;  %v536_v15 = vld [vmem:[%s522_s24 + $0x20] sm:$0xff]  ;;  %v596_v17 = vld [vmem:[%s531_s28 + $0x30] sm:$0xff] }
  0x22   : > { %v537_v14 = vld [vmem:[%s522_s24 + $0x28] sm:$0xff]  ;;  %v2514_v16 = vpack.c.bf16 %v595_v13, %v594_v12  ;;  %v597_v18 = vld [vmem:[%s531_s28 + $0x38] sm:$0xff]  ;;  %v538_v20 = vld [vmem:[%s522_s24 + $0x30] sm:$0xff]  ;;  %2537 = vmatpush3.bf16.msra.mxu1 %v2534_v36  ;;  %s2043_s28 = sshll.u32 %s2997_s16, 3  ;;  %s2860_s16 = smov 40  }
  0x23   : > { %552 = vperm.xlu1 %2735, %v535_v4   ;;  %546 = vperm.xlu0 %2734, %v533_v5   ;;  %v539_v19 = vld [vmem:[%s522_s24 + $0x38] sm:$0xff]  ;;  %v2518_v21 = vpack.c.bf16 %v597_v18, %v596_v17  ;;  %v870_v5 = vld [vmem:[%s3418_s6 + $0x30] sm:$0xff]  ;;  %v872_v12 = vld [vmem:[%s3418_s6 + $0x40] sm:$0xff]  ;;  %s526_s18 = scalar_lea.vmem %s3413_s1, %s2043_s28 }
  0x24   : > { %2507 = vmatprep.subr.bf16.mxu0 %v2506_v10  ;;  %2539 = vmatprep.subr.bf16.mxu1 %v2538_v39  ;;  %v871_v6 = vld [vmem:[%s3418_s6 + $0x38] sm:$0xff]  ;;  %v873_v13 = vld [vmem:[%s3418_s6 + $0x48] sm:$0xff] }
  0x25   : > { %2509 = vmatpush3.bf16.msra.mxu0 %v2506_v10  ;;  %v2566_v9 = vpack.c.bf16 %v871_v6, %v870_v5  ;;  %v875_v17 = vld [vmem:[%s3418_s6 + $0x58] sm:$0xff]  ;;  %v3165_v6 = vld [vmem:[%s3417_s5] ss:$0 sm:$0xff] }
  0x26   : > { %2511 = vmatprep.subr.bf16.mxu0 %v2510_v11  ;;  %2541 = vmatpush3.bf16.msra.mxu1 %v2538_v39  ;;  %v1049_v39 = vld [vmem:[%s3420_s8 + $0x8] sm:$0xff] }
  0x27   : > { %558 = vperm.xlu1 %2735, %v537_v14   ;;  %555 = vperm.xlu0 %2734, %v536_v15   ;;  %v2570_v14 = vpack.c.bf16 %v873_v13, %v872_v12  ;;  %v2586_v40 = vpack.c.bf16 %v1049_v39, %v1048_v38 }
  0x28   : > { %2543 = vmatprep.subr.bf16.mxu1 %v2542_v42 }
  0x29   : > { %2513 = vmatpush3.bf16.msra.mxu0 %v2510_v11 }
  0x2a   : > { %2515 = vmatprep.subr.bf16.mxu0 %v2514_v16  ;;  %2545 = vmatpush3.bf16.msra.mxu1 %v2542_v42  ;;  %v1051_v42 = vld [vmem:[%s3420_s8 + $0x18] sm:$0xff] }
  0x2b   : > { %564 = vperm.xlu1 %2735, %v539_v19   ;;  %561 = vperm.xlu0 %2734, %v538_v20   ;;  %v876_v19 = vld [vmem:[%s3418_s6 + $0x60] sm:$0xff]  ;;  %v877_v20 = vld [vmem:[%s3418_s6 + $0x68] sm:$0xff]  ;;  %v2590_v43 = vpack.c.bf16 %v1051_v42, %v1050_v41 }
  0x2c   : > { %2547 = vmatprep.subr.bf16.mxu1 %v2546_v45 }
  0x2d   : > { %2517 = vmatpush3.bf16.msra.mxu0 %v2514_v16  ;;  %v874_v16 = vld [vmem:[%s3418_s6 + $0x50] sm:$0xff] }
  0x2e   : > { %2519 = vmatprep.subr.bf16.mxu0 %v2518_v21  ;;  %2549 = vmatpush3.bf16.msra.mxu1 %v2546_v45  ;;  %v2574_v18 = vpack.c.bf16 %v875_v17, %v874_v16  ;;  %v1053_v45 = vld [vmem:[%s3420_s8 + $0x28] sm:$0xff] }
  0x2f   : > { %2551 = vmatprep.subr.bf16.mxu1 %v2550_v48  ;;  %v2594_v46 = vpack.c.bf16 %v1053_v45, %v1052_v44 }
  0x31   : > { %2521 = vmatpush3.bf16.msra.mxu0 %v2518_v21  ;;  %v2578_v21 = vpack.c.bf16 %v877_v20, %v876_v19 }
  0x32   : > { %2555 = vmatprep.subr.bf16.mxu0 %v2554_v29  ;;  %2553 = vmatpush3.bf16.msra.mxu1 %v2550_v48  ;;  %v1055_v48 = vld [vmem:[%s3420_s8 + $0x38] sm:$0xff] }
  0x33   : > { %2587 = vmatprep.subr.bf16.mxu1 %v2586_v40 }
  0x9e   : > { %v550_v51 = vpop.permute.xlu1 %549  ;;  %v544_v52 = vpop.permute.xlu0 %543 }
  0x9f   : > { %vm566_vm1 = vcmp.eq.s32.totalorder %v3061_v50, %v544_v52  ;;  %vm568_vm2 = vcmp.eq.s32.totalorder %v3061_v50, %v550_v51  ;;  %v2598_v51 = vpack.c.bf16 %v1055_v48, %v1054_v47  ;;  %v2063_v52 = vld [vmem:[%s3419_s7] ss:$0 sm:$0xff] }
  0xa0   : > { %v2046_v54 = vsel %vm566_vm1, 1.0, %v2853_v53  ;;  %v2048_v59 = vsel %vm568_vm2, 1.0, %v2853_v53  ;;  %vm1228_vm1 = vcmask 130048   ;;  %vm1230_vm2 = vcmask 195584  }
  0xa1   : > { %2248 = vmatprep.mubr.msk.f32.mxu0 %vm598_vm0, %v2046_v54 }
  0xa2   : > { %v553_v57 = vpop.permute.xlu1 %552  ;;  %v547_v58 = vpop.permute.xlu0 %546 }
  0xa3   : > { %vm567_vm3 = vcmp.eq.s32.totalorder %v3061_v50, %v547_v58  ;;  %vm569_vm4 = vcmp.eq.s32.totalorder %v3061_v50, %v553_v57 }
  0xa4   : > { %v2047_v61 = vsel %vm567_vm3, 1.0, %v2853_v53  ;;  %v2049_v3 = vsel %vm569_vm4, 1.0, %v2853_v53  ;;  %vm1232_vm3 = vcmask 261120   ;;  %vm1234_vm4 = vcmask 326656  }
  0xa5   : > { %2249 = vmatmul.mubr.msk.f32.vlgmr.msra.gmra.mrb[0].mxu0 %vm598_vm0, %v2047_v61 }
  0xa6   : > { %v559_v0 = vpop.permute.xlu1 %558  ;;  %2251 = vmatprep.mubr.msk.f32.mxu0 %vm598_vm0, %v2048_v59  ;;  %v556_v1 = vpop.permute.xlu0 %555  ;;  %2557 = vmatpush3.bf16.msra.mxu0 %v2554_v29 }
  0xa7   : > { %vm570_vm5 = vcmp.eq.s32.totalorder %v3061_v50, %v556_v1  ;;  %2559 = vmatprep.subr.bf16.mxu0 %v2558_v60  ;;  %vm571_vm6 = vcmp.eq.s32.totalorder %v3061_v50, %v559_v0 }
  0xa8   : > { %v2050_v4 = vsel %vm570_vm5, 1.0, %v2853_v53  ;;  %v2051_v10 = vsel %vm571_vm6, 1.0, %v2853_v53  ;;  %vm1236_vm5 = vcmask 392192   ;;  %vm1238_vm6 = vcmask 457728  }
  0xa9   : > { %2252 = vmatmul.mubr.msk.f32.gmra.mrb[2].mxu0 %vm598_vm0, %v2049_v3 }
  0xaa   : > { %v565_v7 = vpop.permute.xlu1 %564  ;;  %2254 = vmatprep.mubr.msk.f32.mxu0 %vm598_vm0, %v2050_v4  ;;  %v562_v8 = vpop.permute.xlu0 %561  ;;  %2561 = vmatpush3.bf16.msra.mxu0 %v2558_v60 }
  0xab   : > { %vm572_vm7 = vcmp.eq.s32.totalorder %v3061_v50, %v562_v8  ;;  %2563 = vmatprep.subr.bf16.mxu0 %v2562_v2  ;;  %vm573_vm8 = vcmp.eq.s32.totalorder %v3061_v50, %v565_v7 }
  0xac   : > { %v2052_v11 = vsel %vm572_vm7, 1.0, %v2853_v53  ;;  %v2053_v15 = vsel %vm573_vm8, 1.0, %v2853_v53 }
  0xad   : > { %2255 = vmatmul.mubr.msk.f32.gmra.mrb[4].mxu0 %vm598_vm0, %v2051_v10 }
  0xae   : > { %2257 = vmatprep.mubr.msk.f32.mxu0 %vm598_vm0, %v2052_v11  ;;  %2565 = vmatpush3.bf16.msra.mxu0 %v2562_v2 }
  0xaf   : > { %2567 = vmatprep.subr.bf16.mxu0 %v2566_v9 }
  0xb1   : > { %2258 = vmatmul.mubr.msk.f32.gmra.mrb[6].mxu0 %vm598_vm0, %v2053_v15 }
  0xb2   : > { %2569 = vmatpush3.bf16.msra.mxu0 %v2566_v9 }
  0xb3   : > { %2571 = vmatprep.subr.bf16.mxu0 %v2570_v14 }
  0xb6   : > { %2573 = vmatpush3.bf16.msra.mxu0 %v2570_v14 }
  0xb7   : > { %2575 = vmatprep.subr.bf16.mxu0 %v2574_v18 }
  0xba   : > { %2577 = vmatpush3.bf16.msra.mxu0 %v2574_v18 }
  0xbb   : > { %2579 = vmatprep.subr.bf16.mxu0 %v2578_v21 }
  0xbe   : > { %2581 = vmatpush3.bf16.msra.mxu0 %v2578_v21 }
  0xbf   : > { %2583 = vmatprep.subr.bf16.mxu0 %v2582_v24 }
  0xc2   : > { %2585 = vmatpush3.bf16.msra.mxu0 %v2582_v24 }
  0xc3   : > { %2614 = vmatprep.subr.bf16.mxu0 %v2854_v25 }
 0x178   : > { %v2250_v26 = vpop.f32.mrb[0].mxu0 }
 0x179   : > { %v689_v27 = vpop.f32.mrb[1].mxu0 }
 0x17a   : > { %v2615_v28 = vpack.c.bf16 %v2250_v26, %v689_v27  ;;  %2292 = vmatprep.mubr.f32.mxu1 %v689_v27  ;;  %2336 = vmatprep.mubr.f32.mxu0 %v689_v27 }
 0x17b   : > { %2293 = vmatmul.mubr.f32.vlgmr.msra.gmra.mrb[0].mxu1 %v2250_v26  ;;  %2337 = vmatmul.mubr.f32.vlgmr.msra.gmra.mrb[8].mxu0 %v2250_v26 }
 0x17c   : > { %v2253_v29 = vpop.f32.mrb[2].mxu0  ;;  %2616 = vmatpush3.bf16.msra.mxu0 %v2615_v28  ;;  %2589 = vmatpush3.bf16.msra.mxu1 %v2586_v40 }
 0x17d   : > { %v699_v30 = vpop.f32.mrb[3].mxu0  ;;  %2617 = vmatprep.subr.bf16.mxu0 %v2854_v25  ;;  %2591 = vmatprep.subr.bf16.mxu1 %v2590_v43 }
 0x17e   : > { %v2618_v31 = vpack.c.bf16 %v2253_v29, %v699_v30  ;;  %2295 = vmatprep.mubr.f32.mxu1 %v699_v30  ;;  %2339 = vmatprep.mubr.f32.mxu0 %v699_v30 }
 0x17f   : > { %2296 = vmatmul.mubr.f32.gmra.mrb[2].mxu1 %v2253_v29  ;;  %2340 = vmatmul.mubr.f32.gmra.mrb[10].mxu0 %v2253_v29 }
 0x180   : > { %v2256_v32 = vpop.f32.mrb[4].mxu0  ;;  %2619 = vmatpush3.bf16.msra.mxu0 %v2618_v31  ;;  %2593 = vmatpush3.bf16.msra.mxu1 %v2590_v43 }
 0x181   : > { %v709_v33 = vpop.f32.mrb[5].mxu0  ;;  %2620 = vmatprep.subr.bf16.mxu0 %v2854_v25  ;;  %2595 = vmatprep.subr.bf16.mxu1 %v2594_v46 }
 0x182   : > { %v2621_v34 = vpack.c.bf16 %v2256_v32, %v709_v33  ;;  %2298 = vmatprep.mubr.f32.mxu1 %v709_v33  ;;  %2342 = vmatprep.mubr.f32.mxu0 %v709_v33 }
 0x183   : > { %2299 = vmatmul.mubr.f32.gmra.mrb[4].mxu1 %v2256_v32  ;;  %2343 = vmatmul.mubr.f32.gmra.mrb[12].mxu0 %v2256_v32 }
 0x184   : > { %v2259_v35 = vpop.f32.mrb[6].mxu0  ;;  %2622 = vmatpush3.bf16.msra.mxu0 %v2621_v34  ;;  %2597 = vmatpush3.bf16.msra.mxu1 %v2594_v46 }
 0x185   : > { %v719_v36 = vpop.f32.mrb[7].mxu0  ;;  %2623 = vmatprep.subr.bf16.mxu0 %v2854_v25  ;;  %2599 = vmatprep.subr.bf16.mxu1 %v2598_v51 }
 0x186   : > { %v2624_v37 = vpack.c.bf16 %v2259_v35, %v719_v36  ;;  %2301 = vmatprep.mubr.f32.mxu1 %v719_v36  ;;  %2345 = vmatprep.mubr.f32.mxu0 %v719_v36 }
 0x187   : > { %2302 = vmatmul.mubr.f32.gmra.mrb[6].mxu1 %v2259_v35  ;;  %2346 = vmatmul.mubr.f32.gmra.mrb[14].mxu0 %v2259_v35 }
 0x188   : > { %2625 = vmatpush3.bf16.msra.mxu0 %v2624_v37  ;;  %2601 = vmatpush3.bf16.msra.mxu1 %v2598_v51 }
 0x189   : > { %2642 = vmatprep.subr.bf16.mxu0 %v2854_v25  ;;  %2602 = vmatprep.subr.bf16.mxu1 %v2854_v25 }
 0x18a   : > { %2416 = vmatprep.mubr.msk.f32.mxu0 %vm2855_vm9, %v2853_v53 }
 0x24e   : > { %v2294_v54 = vpop.f32.mrb[0].mxu1  ;;  %v2338_v55 = vpop.f32.mrb[8].mxu0 }
 0x24f   : > { %v959_v56 = vadd.f32 %v2338_v55, %v2063_v52  ;;  %v817_v57 = vpop.f32.mrb[1].mxu1  ;;  %v953_v58 = vpop.f32.mrb[9].mxu0  ;;  %v823_v15 = vadd.f32 %v2294_v54, %v3165_v6 }
 0x250   : > { %v954_v59 = vadd.f32 %v2063_v52, %v953_v58  ;;  %v818_v22 = vadd.f32 %v3165_v6, %v817_v57 }
 0x251   : > { %v993_v60 = vsub.f32 0.0, %v959_v56 }
 0x252   : > { %v992_v61 = vsub.f32 0.0, %v954_v59  ;;  %v2297_v62 = vpop.f32.mrb[2].mxu1  ;;  %v2341_v63 = vpop.f32.mrb[10].mxu0 }
 0x253   : > { %v1002_v0 = vmul.f32 1.442695, %v993_v60  ;;  %v969_v1 = vadd.f32 %v2341_v63, %v2063_v52  ;;  %v827_v2 = vpop.f32.mrb[3].mxu1  ;;  %v963_v3 = vpop.f32.mrb[11].mxu0  ;;  %v833_v28 = vadd.f32 %v2297_v62, %v3165_v6 }
 0x254   : > { %v1000_v4 = vmul.f32 1.442695, %v992_v61  ;;  %v964_v5 = vadd.f32 %v2063_v52, %v963_v3  ;;  %v828_v39 = vadd.f32 %v3165_v6, %v827_v2 }
 0x255   : > { %2736 = vpow2.f32 %v1002_v0  ;;  %v995_v7 = vsub.f32 0.0, %v969_v1 }
 0x256   : > { %2738 = vpow2.f32 %v1000_v4  ;;  %v994_v8 = vsub.f32 0.0, %v964_v5  ;;  %v2300_v9 = vpop.f32.mrb[4].mxu1  ;;  %v2344_v10 = vpop.f32.mrb[12].mxu0 }
 0x257   : > { %v1006_v11 = vmul.f32 1.442695, %v995_v7  ;;  %v979_v12 = vadd.f32 %v2344_v10, %v2063_v52  ;;  %v837_v13 = vpop.f32.mrb[5].mxu1  ;;  %v973_v14 = vpop.f32.mrb[13].mxu0  ;;  %v843_v43 = vadd.f32 %v2300_v9, %v3165_v6 }
 0x258   : > { %v1004_v16 = vmul.f32 1.442695, %v994_v8  ;;  %v974_v17 = vadd.f32 %v2063_v52, %v973_v14  ;;  %v838_v45 = vadd.f32 %v3165_v6, %v837_v13 }
 0x259   : > { %2740 = vpow2.f32 %v1006_v11  ;;  %v997_v18 = vsub.f32 0.0, %v979_v12 }
 0x25a   : > { %2742 = vpow2.f32 %v1004_v16  ;;  %v996_v19 = vsub.f32 0.0, %v974_v17  ;;  %v2303_v20 = vpop.f32.mrb[6].mxu1  ;;  %v2347_v21 = vpop.f32.mrb[14].mxu0 }
 0x25b   : > { %v1010_v23 = vmul.f32 1.442695, %v997_v18  ;;  %v989_v24 = vadd.f32 %v2347_v21, %v2063_v52  ;;  %v847_v26 = vpop.f32.mrb[7].mxu1  ;;  %v983_v27 = vpop.f32.mrb[15].mxu0  ;;  %2744 = vtanh.f32 %v823_v15  ;;  %v853_v55 = vadd.f32 %v2303_v20, %v3165_v6 }
 0x25c   : > { %v1008_v29 = vmul.f32 1.442695, %v996_v19  ;;  %v984_v30 = vadd.f32 %v2063_v52, %v983_v27  ;;  %v848_v60 = vadd.f32 %v3165_v6, %v847_v26  ;;  %v2064_v19 = vld [vmem:[#allocation2] ss:$0 sm:$0xff] }
 0x25d   : > { %2746 = vpow2.f32 %v1010_v23  ;;  %v999_v31 = vsub.f32 0.0, %v989_v24 }
 0x25e   : > { %2748 = vpow2.f32 %v1008_v29  ;;  %v998_v32 = vsub.f32 0.0, %v984_v30 }
 0x25f   : > { %v2737_v33 = vpop.eup %2736  ;;  %2750 = vtanh.f32 %v818_v22  ;;  %v1014_v34 = vmul.f32 1.442695, %v999_v31 }
 0x260   : > { %v2739_v35 = vpop.eup %2738  ;;  %v1017_v36 = vadd.f32 1.0, %v2737_v33  ;;  %2752 = vtanh.f32 %v833_v28  ;;  %v1012_v37 = vmul.f32 1.442695, %v998_v32 }
 0x261   : > { %v1016_v38 = vadd.f32 1.0, %v2739_v35  ;;  %2754 = vpow2.f32 %v1014_v34 }
 0x262   : > { %2756 = vrcp.f32 %v1017_v36 }
 0x263   : > { %v2741_v40 = vpop.eup %2740  ;;  %2758 = vrcp.f32 %v1016_v38 }
 0x264   : > { %v2743_v41 = vpop.eup %2742  ;;  %v1019_v42 = vadd.f32 1.0, %v2741_v40  ;;  %2760 = vpow2.f32 %v1012_v37  ;;  %v1193_v37 = vshrl.u32 %v540_v49, 7 }
 0x265   : > { %2762 = vtanh.f32 %v828_v39  ;;  %v1018_v44 = vadd.f32 1.0, %v2743_v41  ;;  %v2745_v46 = vpop.eup %2744 }
 0x266   : > { %2764 = vrcp.f32 %v1019_v42  ;;  %vm1201_vm10 = vcmp.eq.s32.totalorder %v1193_v37, %v3061_v50  ;;  %v1194_v49 = vmul.u32 8, %v1193_v37  ;;  %v1530_v37 = vld [vmem:[%s3422_s10 + $0x30] sm:$0xff] }
 0x267   : > { %v2747_v47 = vpop.eup %2746  ;;  %2766 = vrcp.f32 %v1018_v44  ;;  %v3190_v38 = vsel %vm1201_vm10, 1.0, %v2853_v53 }
 0x268   : > { %v2749_v48 = vpop.eup %2748  ;;  %2768 = vtanh.f32 %v843_v43  ;;  %v1021_v51 = vadd.f32 1.0, %v2747_v47  ;;  %vm1195_vm11 = vcmp.ge.s32.totalorder %v3061_v50, %v1194_v49 }
 0x269   : > { %v2751_v52 = vpop.eup %2750  ;;  %2770 = vtanh.f32 %v838_v45  ;;  %v1020_v54 = vadd.f32 1.0, %v2749_v48 }
 0x26a   : > { %v2753_v56 = vpop.eup %2752  ;;  %2772 = vrcp.f32 %v1021_v51 }
 0x26b   : > { %v2755_v57 = vpop.eup %2754  ;;  %2774 = vrcp.f32 %v1020_v54 }
 0x26c   : > { %v2757_v58 = vpop.eup %2756  ;;  %v1023_v59 = vadd.f32 1.0, %v2755_v57  ;;  %2776 = vtanh.f32 %v853_v55 }
 0x26d   : > { %v2759_v61 = vpop.eup %2758  ;;  %v1041_v62 = vmul.f32 %v2757_v58, %v2745_v46 }
 0x26e   : > { %v2761_v63 = vpop.eup %2760  ;;  %2778 = vrcp.f32 %v1023_v59  ;;  %v1040_v0 = vmul.f32 %v2759_v61, %v2751_v52 }
 0x26f   : > { %v2763_v1 = vpop.eup %2762  ;;  %v1022_v2 = vadd.f32 1.0, %v2761_v63  ;;  %2780 = vtanh.f32 %v848_v60 }
 0x270   : > { %v2765_v3 = vpop.eup %2764  ;;  %2364 = vmatprep.mubr.msk.f32.mxu1 %vm598_vm0, %v1040_v0 }
 0x271   : > { %v2767_v4 = vpop.eup %2766  ;;  %2782 = vrcp.f32 %v1022_v2  ;;  %2365 = vmatmul.mubr.msk.f32.vlgmr.msra.gmra.mrb[8].mxu1 %vm598_vm0, %v1041_v62  ;;  %v1043_v5 = vmul.f32 %v2765_v3, %v2753_v56  ;;  %v1196_v56 = vadd.s32 8, %v1194_v49 }
 0x272   : > { %v2769_v7 = vpop.eup %2768  ;;  %v1042_v8 = vmul.f32 %v2767_v4, %v2763_v1 }
 0x273   : > { %v2771_v6 = vpop.eup %2770  ;;  %vm1197_vm12 = vcmp.lt.s32.totalorder %v3061_v50, %v1196_v56  ;;  %v1361_v50 = vld [vmem:[%s526_s18] sm:$0xff]  ;;  %v1765_v56 = vld [vmem:[%s3424_s12 + $0x10] sm:$0xff] }
 0x274   : > { %v2773_v9 = vpop.eup %2772  ;;  %2367 = vmatprep.mubr.msk.f32.mxu1 %vm598_vm0, %v1042_v8  ;;  %vm1198_vm13 = vmand %vm1195_vm11, %vm1197_vm12  ;;  %vm1362_vm14 = vcmp.eq.s32.totalorder %v1361_v50, 0  ;;  %v1769_v50 = vld [vmem:[%s3424_s12 + $0x30] sm:$0xff] }
 0x275   : > { %v2775_v10 = vpop.eup %2774  ;;  %2368 = vmatmul.mubr.msk.f32.gmra.mrb[10].mxu1 %vm598_vm0, %v1043_v5  ;;  %v1045_v11 = vmul.f32 %v2773_v9, %v2769_v7  ;;  %v3206_v63 = vsel %vm1198_vm13, 1.0, %v2853_v53 }
 0x276   : > { %v1044_v12 = vmul.f32 %v2775_v10, %v2771_v6  ;;  %v2777_v13 = vpop.eup %2776 }
 0x278   : > { %v2779_v14 = vpop.eup %2778  ;;  %2370 = vmatprep.mubr.msk.f32.mxu1 %vm598_vm0, %v1044_v12 }
 0x279   : > { %2371 = vmatmul.mubr.msk.f32.gmra.mrb[12].mxu1 %vm598_vm0, %v1045_v11  ;;  %v1047_v15 = vmul.f32 %v2779_v14, %v2777_v13  ;;  %v2781_v16 = vpop.eup %2780 }
 0x27b   : > { %v2783_v17 = vpop.eup %2782 }
 0x27c   : > { %v1046_v18 = vmul.f32 %v2783_v17, %v2781_v16 }
 0x27e   : > { %2373 = vmatprep.mubr.msk.f32.mxu1 %vm598_vm0, %v1046_v18 }
 0x27f   : > { %2374 = vmatmul.mubr.msk.f32.gmra.mrb[14].mxu1 %vm598_vm0, %v1047_v15 }
 0x280   : > { %2392 = vmatprep.mubr.msk.f32.mxu1 %vm2855_vm9, %v2853_v53 }
 0x344   : > { %v2366_v20 = vpop.f32.mrb[8].mxu1 }
 0x345   : > { %v1159_v21 = vadd.f32 %v2366_v20, %v2064_v19  ;;  %v1153_v22 = vpop.f32.mrb[9].mxu1  ;;  %v1525_v20 = vld [vmem:[%s3422_s10 + $0x8] sm:$0xff] }
 0x346   : > { %v1154_v23 = vadd.f32 %v2064_v19, %v1153_v22 }
 0x347   : > { %1247 = vperm.xlu1 %2735, %v1159_v21  }
 0x348   : > { %v2369_v24 = vpop.f32.mrb[10].mxu1  ;;  %1242 = vperm.xlu0 %2734, %v1154_v23  }
 0x349   : > { %v1169_v26 = vadd.f32 %v2369_v24, %v2064_v19  ;;  %v1163_v27 = vpop.f32.mrb[11].mxu1 }
 0x34a   : > { %v1164_v28 = vadd.f32 %v2064_v19, %v1163_v27 }
 0x34b   : > { %1257 = vperm.xlu1 %2735, %v1169_v26  }
 0x34c   : > { %v2372_v29 = vpop.f32.mrb[12].mxu1  ;;  %1252 = vperm.xlu0 %2734, %v1164_v28   ;;  %v1526_v28 = vld [vmem:[%s3422_s10 + $0x10] sm:$0xff] }
 0x34d   : > { %v1179_v30 = vadd.f32 %v2372_v29, %v2064_v19  ;;  %v1173_v31 = vpop.f32.mrb[13].mxu1  ;;  %v1527_v29 = vld [vmem:[%s3422_s10 + $0x18] sm:$0xff] }
 0x34e   : > { %v1174_v32 = vadd.f32 %v2064_v19, %v1173_v31 }
 0x34f   : > { %1267 = vperm.xlu1 %2735, %v1179_v30  }
 0x350   : > { %1262 = vperm.xlu0 %2734, %v1174_v32   ;;  %v2630_v32 = vpack.c.bf16 %v1527_v29, %v1526_v28 }
 0x352   : > { %v2375_v33 = vpop.f32.mrb[14].mxu1 }
 0x353   : > { %v1189_v34 = vadd.f32 %v2375_v33, %v2064_v19  ;;  %v1183_v35 = vpop.f32.mrb[15].mxu1  ;;  %v1522_v33 = vld [vmem:[%s3415_s3] sm:$0xff] }
 0x354   : > { %v1184_v36 = vadd.f32 %v2064_v19, %v1183_v35  ;;  %v1524_v19 = vld [vmem:[%s3422_s10] sm:$0xff]  ;;  %v1529_v35 = vld [vmem:[%s3422_s10 + $0x28] sm:$0xff] }
 0x355   : > { %1277 = vperm.xlu1 %2735, %v1189_v34   ;;  %v2626_v24 = vpack.c.bf16 %v1525_v20, %v1524_v19  ;;  %v1528_v34 = vld [vmem:[%s3422_s10 + $0x20] sm:$0xff] }
 0x356   : > { %1272 = vperm.xlu0 %2734, %v1184_v36   ;;  %v2634_v36 = vpack.c.bf16 %v1529_v35, %v1528_v34 }
 0x359   : > { %1208 = vrot.lane.b32.xlu1 %v3190_v38, %s2856_s22 }
 0x35d   : > { %1214 = vrot.lane.b32.xlu1 %v3190_v38, %s2857_s25  ;;  %s2085_s25 = sshll.u32 %s2968_s9, 7  ;;  %s2863_s9 = smov [#allocation3]  }
 0x3c6   : > { %v1248_v39 = vpop.permute.xlu1 %1247 }
 0x3c7   : > { %v1281_v40 = vmul.f32 %v3190_v38, %v1248_v39  ;;  %v1243_v41 = vpop.permute.xlu0 %1242 }
 0x3c8   : > { %v1280_v42 = vmul.f32 %v3190_v38, %v1243_v41 }
 0x3ca   : > { %v2603_v43 = vpack.c.bf16 %v1281_v40, %v1280_v42  ;;  %v1258_v44 = vpop.permute.xlu1 %1257  ;;  %v1523_v40 = vld [vmem:[%s3415_s3 + $0x8] sm:$0xff] }
 0x3cb   : > { %v1283_v45 = vmul.f32 %v3190_v38, %v1258_v44  ;;  %v1253_v46 = vpop.permute.xlu0 %1252  ;;  %v2646_v41 = vpack.c.bf16 %v1523_v40, %v1522_v33 }
 0x3cc   : > { %v1282_v47 = vmul.f32 %v3190_v38, %v1253_v46  ;;  %2604 = vmatpush3.bf16.msra.mxu1 %v2603_v43 }
 0x3cd   : > { %2605 = vmatprep.subr.bf16.mxu1 %v2854_v25 }
 0x3ce   : > { %v2606_v48 = vpack.c.bf16 %v1283_v45, %v1282_v47  ;;  %v1268_v51 = vpop.permute.xlu1 %1267  ;;  %v2078_v45 = vld [vmem:[%s3423_s11] ss:$0 sm:$0xff] }
 0x3cf   : > { %v1285_v52 = vmul.f32 %v3190_v38, %v1268_v51  ;;  %v1263_v54 = vpop.permute.xlu0 %1262 }
 0x3d0   : > { %v1284_v55 = vmul.f32 %v3190_v38, %v1263_v54  ;;  %2607 = vmatpush3.bf16.msra.mxu1 %v2606_v48  ;;  %v1764_v54 = vld [vmem:[%s3424_s12 + $0x8] sm:$0xff] }
 0x3d1   : > { %2608 = vmatprep.subr.bf16.mxu1 %v2854_v25 }
 0x3d2   : > { %v2609_v57 = vpack.c.bf16 %v1285_v52, %v1284_v55  ;;  %v1763_v52 = vld [vmem:[%s3424_s12] sm:$0xff] }
 0x3d3   : > { %v2661_v55 = vpack.c.bf16 %v1764_v54, %v1763_v52 }
 0x3d4   : > { %v1278_v58 = vpop.permute.xlu1 %1277  ;;  %2610 = vmatpush3.bf16.msra.mxu1 %v2609_v57  ;;  %v1766_v57 = vld [vmem:[%s3424_s12 + $0x18] sm:$0xff] }
 0x3d5   : > { %v1287_v59 = vmul.f32 %v3190_v38, %v1278_v58  ;;  %v1273_v60 = vpop.permute.xlu0 %1272  ;;  %2611 = vmatprep.subr.bf16.mxu1 %v2854_v25 }
 0x3d6   : > { %v1286_v61 = vmul.f32 %v3190_v38, %v1273_v60  ;;  %v2664_v60 = vpack.c.bf16 %v1766_v57, %v1765_v56 }
 0x3d8   : > { %v2612_v62 = vpack.c.bf16 %v1287_v59, %v1286_v61  ;;  %v1209_v10 = vpop.permute.xlu1 %1208  ;;  %v1767_v61 = vld [vmem:[%s3424_s12 + $0x20] sm:$0xff] }
 0x3da   : > { %2613 = vmatpush3.bf16.msra.mxu1 %v2612_v62  ;;  %v1768_v62 = vld [vmem:[%s3424_s12 + $0x28] sm:$0xff] }
 0x3db   : > { %2395 = vmatprep.subr.mxu1 %v2853_v53 }
 0x3dc   : > { %v1215_v14 = vpop.permute.xlu1 %1214 }
 0x3dd   : > { %2393 = vmatmul.mubr.msk.f32.vlgmr.msra.gmra.mrb[16].mxu1 %vm598_vm0, %v3206_v63 }
 0x3de   : > { %2397 = vmatprep.mubr.msk.f32.mxu1 %vm2855_vm9, %v2853_v53 }
 0x4b0   : > { %v1357_v0 = vpop.f32.mrb[16].mxu1 }
 0x4b1   : > { %v1363_v1 = vsel %vm1362_vm14, -1e+25, %v1357_v0  ;;  %v2394_v2 = vpop.f32.mrb[17].mxu1  ;;  %v1770_v0 = vld [vmem:[%s3424_s12 + $0x38] sm:$0xff] }
 0x4b2   : > { %v1364_v3 = vsel %vm1226_vm15, %v1363_v1, -inf  ;;  %v1771_v2 = vld [vmem:[%s3424_s12 + $0x40] sm:$0xff] }
 0x4b3   : > { %1365 = vmax.xlane.f32.xlu0 %v1364_v3  ;;  %v1772_v3 = vld [vmem:[%s3424_s12 + $0x48] sm:$0xff] }
 0x4c9   : > { %1205 = vrot.lane.b32.xlu0 %v3190_v38, %s2858_s19  ;;  %s3370_s19 = scalar_lea.hbm %s3427_s15, %s2085_s25 }
 0x4cd   : > { %1211 = vrot.lane.b32.xlu0 %v3190_v38, %s2859_s26 }
 0x4d1   : > { %1217 = vrot.lane.b32.xlu0 %v3190_v38, %s2860_s16 }
 0x4d5   : > { %1223 = vrot.lane.b32.xlu0 %v3190_v38, %s2861_s27  ;;  %s515_s27 = sand.u32 1, %s2842_s21  }
 0x4d6   : > { %s1940_s26 = scalar_lea.sflag [#allocation4], %s515_s27 }
 0x540   : > { %v1366_v4 = vpop.xlane.xlu0 %1365 }
 0x541   : > { %v1367_v5 = vsub.f32 %v1363_v1, %v1366_v4  ;;  %v2670_v1 = vpack.c.bf16 %v1770_v0, %v1769_v50  ;;  %v2673_v4 = vpack.c.bf16 %v1772_v3, %v1771_v2 }
 0x543   : > { %v1368_v7 = vmul.f32 1.442695, %v1367_v5  ;;  %v1773_v5 = vld [vmem:[%s3424_s12 + $0x50] sm:$0xff] }
 0x544   : > { %v1206_v9 = vpop.permute.xlu0 %1205 }
 0x545   : > { %2784 = vpow2.f32 %v1368_v7  ;;  %v1227_v11 = vsel %vm1226_vm15, %v3190_v38, %v1206_v9  ;;  %v1774_v7 = vld [vmem:[%s3424_s12 + $0x58] sm:$0xff]  ;;  %v1776_v9 = vld [vmem:[%s3424_s12 + $0x68] sm:$0xff] }
 0x546   : > { %v1229_v13 = vsel %vm1228_vm1, %v1227_v11, %v1209_v10  ;;  %v1777_v11 = vld [vmem:[%s3424_s12 + $0x70] sm:$0xff] }
 0x548   : > { %v1212_v12 = vpop.permute.xlu0 %1211 }
 0x549   : > { %v1231_v15 = vsel %vm1230_vm2, %v1229_v13, %v1212_v12  ;;  %v1778_v12 = vld [vmem:[%s3424_s12 + $0x78] sm:$0xff] }
 0x54a   : > { %v1233_v18 = vsel %vm1232_vm3, %v1231_v15, %v1215_v14  ;;  %v2682_v13 = vpack.c.bf16 %v1778_v12, %v1777_v11  ;;  %v1779_v14 = vld [vmem:[%s3425_s13] sm:$0xff]  ;;  %v1780_v15 = vld [vmem:[%s3425_s13 + $0x8] sm:$0xff] }
 0x54c   : > { %v1218_v16 = vpop.permute.xlu0 %1217 }
 0x54d   : > { %v1235_v22 = vsel %vm1234_vm4, %v1233_v18, %v1218_v16  ;;  %v2649_v16 = vpack.c.bf16 %v1780_v15, %v1779_v14  ;;  %v1782_v18 = vld [vmem:[%s3425_s13 + $0x18] sm:$0xff] }
 0x54f   : > { %v2785_v8 = vpop.eup %2784 }
 0x550   : > { %v1370_v6 = vsel %vm1226_vm15, %v2785_v8, 0.0  ;;  %v1224_v21 = vpop.permute.xlu0 %1223 }
 0x551   : > { %1371 = vadd.xlane.f32.xlu1 %v1370_v6  ;;  %v1775_v6 = vld [vmem:[%s3424_s12 + $0x60] sm:$0xff] }
 0x552   : > { %v2679_v10 = vpack.c.bf16 %v1776_v9, %v1775_v6 }
 0x562   : > { %1220 = vrot.lane.b32.xlu1 %v3190_v38, %s2862_s0  ;;  %v1531_v38 = vld [vmem:[%s3422_s10 + $0x38] sm:$0xff]  ;;  %s2040_s0 = sshll.u32 %s515_s27, 3 }
 0x563   : > { %v2638_v39 = vpack.c.bf16 %v1531_v38, %v1530_v37  ;;  %s517_s28 = scalar_lea.vmem [#allocation3], %s2040_s0  ;;  %s2792_s0 = sshll.u32 %s2863_s9, 4  ;;  %s2793_s0 = int_to_ptr.vmem [resolvable:$false] %s2792_s0 }
 0x564   : > { %s1953_s24 = sshll.u32 %s517_s28, 4  ;;  %s2794_s2 = scalar_lea.vmem %s2793_s0, 256  ;;  %s3372_s24 = int_to_ptr.vmem [resolvable:$true] %s1953_s24 }
 0x565   : > { %s2788_s16 = scalar_lea.vmem %s3372_s24, 128  ;;  %p2795_p0 = scmp.lt.s32.totalorder %s3372_s24, %s2793_s0 }
 0x566   : > { %p2789_p11 = scmp.ne.s32.totalorder %s3372_s24, %s2788_s16  ;;  %p2796_p1 = scmp.lt.s32.totalorder %s2794_s2, %s2788_s16 }
 0x568   : > { %p2790_p12 = pnand %p2789_p11, %p2985_p5  ;;  %p2797_p2 = por %p2796_p1, %p2795_p0 }
 0x56a   : > { %p2791_p13 = pneg %p2790_p12 }
 0x56c   : > { %p2798_p3 = pnand %p2797_p2, %p2791_p13 }
 0x5de   : > { %v1372_v17 = vpop.xlane.xlu1 %1371 }
 0x5df   : > { %2786 = vrcp.f32 %v1372_v17  ;;  %v1781_v17 = vld [vmem:[%s3425_s13 + $0x10] sm:$0xff] }
 0x5e2   : > { %v1221_v23 = vpop.permute.xlu1 %1220 }
 0x5e3   : > { %v1237_v26 = vsel %vm1236_vm5, %v1235_v22, %v1221_v23  ;;  %v1783_v22 = vld [vmem:[%s3425_s13 + $0x20] sm:$0xff]  ;;  %v1784_v23 = vld [vmem:[%s3425_s13 + $0x28] sm:$0xff] }
 0x5e4   : > { %v1239_v27 = vsel %vm1238_vm6, %v1237_v26, %v1224_v21  ;;  %v2652_v21 = vpack.c.bf16 %v1782_v18, %v1781_v17  ;;  %v1786_v26 = vld [vmem:[%s3425_s13 + $0x38] sm:$0xff] }
 0x5e5   : > { %2396 = vmatpush3.msra.mxu1 %v1239_v27 }
 0x5e6   : > { %2627 = vmatprep.subr.bf16.mxu1 %v2626_v24 }
 0x5e9   : > { %v2787_v30 = vpop.eup %2786 }
 0x5ea   : > { %v1374_v31 = vmul.f32 %v2787_v30, %v2785_v8  ;;  %v2676_v8 = vpack.c.bf16 %v1774_v7, %v1773_v5 }
 0x5ec   : > { %2398 = vmatmul.mubr.msk.f32.vlgmr.msra.gmra.mrb[18].mxu1 %vm1226_vm15, %v1374_v31 }
 0x5ed   : > { %2629 = vmatpush3.bf16.msra.mxu1 %v2626_v24  ;;  %2435 = vmatprep.mubr.msk.f32.mxu1 %vm598_vm0, %v1522_v33  ;;  %v2655_v24 = vpack.c.bf16 %v1784_v23, %v1783_v22  ;;  %v2083_v33 = vld [vmem:[%s3426_s14] ss:$0 sm:$0xff] }
 0x5ee   : > { %2631 = vmatprep.subr.bf16.mxu1 %v2630_v32 }
 0x5f1   : > { %2633 = vmatpush3.bf16.msra.mxu1 %v2630_v32 }
 0x5f2   : > { %2635 = vmatprep.subr.bf16.mxu1 %v2634_v36 }
 0x5f5   : > { %2637 = vmatpush3.bf16.msra.mxu1 %v2634_v36 }
 0x5f6   : > { %2639 = vmatprep.subr.bf16.mxu1 %v2638_v39 }
 0x5f9   : > { %2641 = vmatpush3.bf16.msra.mxu1 %v2638_v39 }
 0x5fa   : > { %2645 = vmatprep.subr.bf16.mxu1 %v2854_v25 }
 0x5fc   : > { %2436 = vmatmul.mubr.msk.f32.vlgmr.msra.gmra.mrb[20].mxu1 %vm598_vm0, %v1523_v40 }
 0x5fd   : > { %2647 = vmatpush3.bf16.msra.mxu1 %v2646_v41  ;;  %2449 = vmatprep.mubr.msk.f32.mxu1 %vm2855_vm9, %v2853_v53 }
 0x5fe   : > { %2648 = vmatprep.subr.bf16.mxu1 %v2854_v25 }
 0x6bf   : > { %v1444_v42 = vpop.f32.mrb[18].mxu1 }
 0x6c0   : > { %v1448_v43 = vmul.f32 %v3206_v63, %v1444_v42  ;;  %v2399_v44 = vpop.f32.mrb[19].mxu1  ;;  %v2667_v63 = vpack.c.bf16 %v1768_v62, %v1767_v61 }
 0x6c2   : > { %2417 = vmatmul.mubr.msk.f32.vlgmr.msra.gmra.mrb[16].mxu0 %vm598_vm0, %v1448_v43 }
 0x6c3   : > { %2442 = vmatprep.mubr.msk.f32.mxu0 %vm2855_vm9, %v2853_v53 }
 0x6cf   : > { %v2437_v46 = vpop.f32.mrb[20].mxu1 }
 0x6d0   : > { %v1617_v47 = vadd.f32 %v2437_v46, %v2078_v45  ;;  %v1611_v49 = vpop.f32.mrb[21].mxu1 }
 0x6d1   : > { %v1612_v48 = vadd.f32 %v2078_v45, %v1611_v49 }
 0x6d3   : > { %v2643_v51 = vpack.c.bf16 %v1617_v47, %v1612_v48 }
 0x6d5   : > { %2644 = vmatpush3.bf16.xpose.msra.mxu0 %v2643_v51 }
 0x6d6   : > { %2660 = vmatprep.subr.bf16.mxu0 %v2854_v25 }
 0x795   : > { %v1518_v58 = vpop.f32.mrb[16].mxu0 }
 0x796   : > { %v2418_v59 = vpop.f32.mrb[17].mxu0  ;;  %2443 = vmatmul.mubr.f32.vlgmr.msra.gmra.mrb[18].mxu0 %v1518_v58 }
 0x797   : > { %2662 = vmatpush3.bf16.msra.mxu0 %v2661_v55  ;;  %2503 = vmatprep.mubr.msk.f32.mxu0 %vm2855_vm9, %v2853_v53 }
 0x798   : > { %2663 = vmatprep.subr.bf16.mxu0 %v2854_v25 }
 0x79b   : > { %2665 = vmatpush3.bf16.msra.mxu0 %v2664_v60 }
 0x79c   : > { %2666 = vmatprep.subr.bf16.mxu0 %v2854_v25 }
 0x79f   : > { %2668 = vmatpush3.bf16.msra.mxu0 %v2667_v63 }
 0x7a0   : > { %2669 = vmatprep.subr.bf16.mxu0 %v2854_v25 }
 0x7a3   : > { %2671 = vmatpush3.bf16.msra.mxu0 %v2670_v1 }
 0x7a4   : > { %2672 = vmatprep.subr.bf16.mxu0 %v2854_v25 }
 0x7a7   : > { %2674 = vmatpush3.bf16.msra.mxu0 %v2673_v4 }
 0x7a8   : > { %2675 = vmatprep.subr.bf16.mxu0 %v2854_v25 }
 0x7ab   : > { %2677 = vmatpush3.bf16.msra.mxu0 %v2676_v8 }
 0x7ac   : > { %2678 = vmatprep.subr.bf16.mxu0 %v2854_v25 }
 0x7af   : > { %2680 = vmatpush3.bf16.msra.mxu0 %v2679_v10 }
 0x7b0   : > { %2681 = vmatprep.subr.bf16.mxu0 %v2854_v25 }
 0x7b3   : > { %2683 = vmatpush3.bf16.msra.mxu0 %v2682_v13 }
 0x7b6   : > { %2504 = vmatmul.mubr.f32.vlgmr.msra.gmra.mrb[20].mxu0 %v1518_v58 }
 0x869   : > { %v1686_v19 = vpop.f32.mrb[18].mxu0 }
 0x86a   : > { %v2444_v20 = vpop.f32.mrb[19].mxu0  ;;  %2450 = vmatmul.mubr.msk.f32.vlgmr.msra.gmra.mrb[22].mxu1 %vm1228_vm1, %v1686_v19 }
 0x86b   : > { %2650 = vmatpush3.bf16.msra.mxu1 %v2649_v16  ;;  %2468 = vmatprep.mubr.msk.f32.mxu1 %vm2855_vm9, %v2853_v53  ;;  %v1785_v53 = vld [vmem:[%s3425_s13 + $0x30] sm:$0xff] }
 0x86c   : > { %2651 = vmatprep.subr.bf16.mxu1 %v2854_v25  ;;  %v2658_v27 = vpack.c.bf16 %v1786_v26, %v1785_v53 }
 0x86f   : > { %2653 = vmatpush3.bf16.msra.mxu1 %v2652_v21 }
 0x870   : > { %2654 = vmatprep.subr.bf16.mxu1 %v2854_v25 }
 0x873   : > { %2656 = vmatpush3.bf16.msra.mxu1 %v2655_v24 }
 0x874   : > { %2657 = vmatprep.subr.bf16.mxu1 %v2854_v25 }
 0x877   : > { %2659 = vmatpush3.bf16.msra.mxu1 %v2658_v27 }
 0x889   : > { %v1926_v28 = vpop.f32.mrb[20].mxu0 }
 0x88a   : > { %v2505_v29 = vpop.f32.mrb[21].mxu0 }
 0x93d   : > { %v1759_v30 = vpop.f32.mrb[22].mxu1 }
 0x93e   : > { %v2451_v31 = vpop.f32.mrb[23].mxu1  ;;  %2469 = vmatmul.mubr.msk.f32.vlgmr.msra.gmra.mrb[24].mxu1 %vm598_vm0, %v1759_v30 }
 0xa11   : > { %v1856_v32 = vpop.f32.mrb[24].mxu1 }
 0xa12   : > { %v1927_v34 = vadd.f32 %v1926_v28, %v1856_v32  ;;  %v2470_v25 = vpop.f32.mrb[25].mxu1 }
 0xa14   : > { %v1937_v35 = vadd.f32 %v2083_v33, %v1927_v34 }
 0xa16   : > { %1938 = vst [vmem:[%s517_s28] sm:$0xff] %v1937_v35 }
 0xa17   : > { %2801 = shalt.err (!%p2798_p3)
}
 0xa18   : > { %s2802_s27 = scalar_lea.hbm %s3370_s19, 128  ;;  %s2806_s28 = scalar_lea.hbm %s3427_s15, 256 }
 0xa19   : > { %p2803_p4 = scmp.ne.s32.totalorder %s3370_s19, %s2802_s27  ;;  %p2807_p9 = scmp.lt.u32.totalorder %s3370_s19, %s3427_s15 }
 0xa1a   : > { %p2808_p10 = scmp.lt.u32.totalorder %s2806_s28, %s2802_s27  ;;  %p2810_p12 = scmp.lt.u32.totalorder %s2802_s27, %s3370_s19 }
 0xa1b   : > { %p2804_p7 = pnand %p2803_p4, %p2985_p5 }
 0xa1c   : > { %p2809_p11 = por %p2808_p10, %p2807_p9 }
 0xa1d   : > { %p2805_p8 = pneg %p2804_p7 }
 0xa1e   : > { %p2811_p13 = por %p2810_p12, %p2809_p11 }
 0xa20   : > { %p2812_p0 = pnand %p2811_p13, %p2805_p8 }
 0xa22   : > { %2815 = shalt.err (!%p2812_p0)
}
 0xa23   : > { %2684 = dma.vmem_to_hbm [thread:$0]  (%p2985_p5), %s3372_s24, 128, %s3370_s19, %s1940_s26  }
 0xa24 PF: > { %p2690_p1 = scmp.ge.s32.totalorder %s2850_s23, 2  ;;  %s1965_s16 = sand.u32 1, %s2838_s20  }
 0xa25   : > { %s1966_s9 = scalar_lea.sflag [#allocation4], %s1965_s16 }
 0xa26   : > { %p2687_p2 = pnand %p2690_p1, %p2989_p6 }
 0xa28   : > { %2833 = dma.done.wait (!%p2687_p2), %s1966_s9, 128  }
 0xa29   : > { %2835 = vsyncadd (!%p2687_p2), %s1966_s9, 4294967168  ;;  %s3440_s23 = sld [smem:[#allocation7_spill]]  ;;  %s3441_s0 = sld [smem:[#allocation6_spill]] }
 0xa2a   : > { %s3442_s22 = sld [smem:[#allocation8_spill]]  ;;  %s3443_s20 = smov %s2842_s21 }
 0xa2f   : > { %p27_p3 = scmp.ge.s32.totalorder %s3440_s23, 4   ;;  %s3444_s21 = smov %s3441_s0 }
 0xa31   :  { %29 = sbr.rel (!%p27_p3) target bundleno = 6 (0x6), region = 121 }
 0xa38   :  { %1971 = vsyncpa [#allocation4], 1 }
 0xa39   :  { %1973 = vsyncpa [#allocation4 + $0x1], 1 }

</bundles_post_ra>
